<compile_context>
chip_gen: v7x
topology: tpu7x:2x2x1
jax: 0.10.0
libtpu: 0.0.40
codegen_flags: <defaults>
</compile_context>

<pallas_src>
import functools

import jax
import jax.numpy as jnp
from jax.experimental import pallas as pl
from jax.experimental.pallas import tpu as pltpu


def _decoder_kernel(xcat_ref,
                    w1_ref, b1_ref, w2_ref, b2_ref, w3_ref, b3_ref,
                    w4_ref, b4_ref, w5_ref, b5_ref, w6_ref, b6_ref,
                    out_ref, *, widths, use_bf16_matmul):
    f32 = jnp.float32
    xcat = xcat_ref[...].astype(f32)

    # Static lane slices of the fused input slab: [x2_e, x3_e, x_in, x4_e, x5_e].
    parts = []
    off = 0
    for w in widths:
        parts.append(xcat[:, off:off + w])
        off += w
    x2e, x3e, x_in, x4e, x5e = parts

    def lin(x, w_ref, b_ref):
        w = w_ref[...]
        if use_bf16_matmul:
            # bf16 operands, f32 accumulation -> native MXU path on v6e/v7x.
            x = x.astype(jnp.bfloat16)
            w = w.astype(jnp.bfloat16)
        else:
            w = w.astype(f32)
        return jnp.dot(x, w, preferred_element_type=f32) + b_ref[...].astype(f32)

    h = jnp.maximum(lin(x_in, w1_ref, b1_ref), 0.0)       # l1
    h = jnp.maximum(lin(h + x5e, w2_ref, b2_ref), 0.0)    # l2  (dropout p=0.0 -> no-op)
    h = jnp.maximum(lin(h + x4e, w3_ref, b3_ref), 0.0)    # l3
    h = jnp.maximum(lin(h + x3e, w4_ref, b4_ref), 0.0)    # l4
    h = jnp.maximum(lin(h + x2e, w5_ref, b5_ref), 0.0)    # l5
    out_ref[...] = lin(h, w6_ref, b6_ref).astype(out_ref.dtype)   # l6, no ReLU


def _choose_row_tile(n_rows, act_bytes_per_row):
    """Largest useful row tile under a conservative (v5e-safe) VMEM budget."""
    budget = 12 * 1024 * 1024        # < v5e's 16 MiB default scoped VMEM
    if 2 * n_rows * act_bytes_per_row <= budget:
        return n_rows                # single grid point: no pipelining overhead
    tile = 2048
    while tile > 8 and (n_rows % tile != 0
                        or 2 * tile * act_bytes_per_row > budget):
        tile //= 2
    return tile


def decoder_forward(x1_e, x2_e, x3_e, x4_e, x5_e, x_in, params,
                    *, row_tile=None, use_bf16_matmul=False):
    """params: dict with 'w1'..'w6' shaped (in, out) and 'b1'..'b6' shaped (1, out)."""
    del x1_e  # unused by the reference forward()
    n_rows = x_in.shape[0]
    out_ch = params["w6"].shape[1]

    # Fuse the row-streams into one lane-dense slab (largest pieces first so no
    # segment straddles a 128-lane boundary for the default channel counts).
    pieces = (x2_e, x3_e, x_in, x4_e, x5_e)
    widths = tuple(int(p.shape[1]) for p in pieces)
    xcat = jnp.concatenate(pieces, axis=1)
    cat_w = int(xcat.shape[1])

    hidden = [params[f"w{i}"].shape[1] for i in range(1, 7)]
    act_bytes_per_row = 4 * (cat_w + sum(hidden) + out_ch)

    if row_tile is None:
        row_tile = _choose_row_tile(n_rows, act_bytes_per_row)
    if n_rows % row_tile != 0:
        # TODO(synk): add a masked tail block for arbitrary row counts; for now
        # fall back to a single whole-array block (correctness first).
        row_tile = n_rows
    grid = (n_rows // row_tile,)

    weights = (params["w1"], params["b1"], params["w2"], params["b2"],
               params["w3"], params["b3"], params["w4"], params["b4"],
               params["w5"], params["b5"], params["w6"], params["b6"])

    # Weights/biases stay resident in VMEM for the whole grid: no per-step
    # re-fetch, no double buffering.
    weight_spec = pl.BlockSpec(memory_space=pltpu.MemorySpace.VMEM)
    in_specs = ([pl.BlockSpec((row_tile, cat_w), lambda i: (i, 0))]
                + [weight_spec] * len(weights))
    out_spec = pl.BlockSpec((row_tile, out_ch), lambda i: (i, 0))

    # Advisory cost estimate so XLA can schedule around the custom call.
    dims = [x_in.shape[1]] + hidden
    flops = 2 * n_rows * sum(dims[i] * dims[i + 1] for i in range(6))
    bytes_accessed = 4 * (xcat.size + sum(int(w.size) for w in weights)
                          + n_rows * out_ch)
    cost = pl.CostEstimate(flops=flops, transcendentals=0,
                           bytes_accessed=bytes_accessed)

    # Raise the scoped-VMEM limit only when the working set actually needs it.
    vmem_need = (2 * row_tile * act_bytes_per_row
                 + 4 * sum(int(w.size) for w in weights))
    vmem_limit = None
    if vmem_need > 14 * 1024 * 1024:
        vmem_limit = min(int(vmem_need * 5 // 4), 96 * 1024 * 1024)

    kernel = functools.partial(_decoder_kernel, widths=widths,
                               use_bf16_matmul=use_bf16_matmul)

    return pl.pallas_call(
        kernel,
        out_shape=jax.ShapeDtypeStruct((n_rows, out_ch), x_in.dtype),
        grid_spec=pltpu.PrefetchScalarGridSpec(
            num_scalar_prefetch=0,
            grid=grid,
            in_specs=in_specs,
            out_specs=out_spec,
        ),
        compiler_params=pltpu.CompilerParams(
            dimension_semantics=("parallel",),
            vmem_limit_bytes=vmem_limit),
        cost_estimate=cost,
    )(xcat, *weights)


def init_params(key, in_channels, out_channels):
    """Deterministic PyTorch-Linear-style init; weights stored as (in, out)."""
    dims = [in_channels,
            out_channels // 32, out_channels // 16, out_channels // 8,
            out_channels // 4, out_channels // 2, out_channels]
    params = {}
    for li in range(6):
        fan_in, fan_out = dims[li], dims[li + 1]
        key, kw, kb = jax.random.split(key, 3)
        bound = 1.0 / jnp.sqrt(jnp.float32(fan_in))
        params[f"w{li+1}"] = jax.random.uniform(
            kw, (fan_in, fan_out), jnp.float32, -bound, bound)
        params[f"b{li+1}"] = jax.random.uniform(
            kb, (1, fan_out), jnp.float32, -bound, bound)
    return params


def decoder_ref(x1_e, x2_e, x3_e, x4_e, x5_e, x_in, params):
    """Pure-JAX reference mirroring the PyTorch forward."""
    del x1_e
    h1 = jnp.maximum(x_in @ params["w1"] + params["b1"], 0.0)
    h2 = jnp.maximum((h1 + x5_e) @ params["w2"] + params["b2"], 0.0)
    h3 = jnp.maximum((h2 + x4_e) @ params["w3"] + params["b3"], 0.0)
    h4 = jnp.maximum((h3 + x3_e) @ params["w4"] + params["b4"], 0.0)
    h5 = jnp.maximum((h4 + x2_e) @ params["w5"] + params["b5"], 0.0)
    return h5 @ params["w6"] + params["b6"]


if __name__ == "__main__":
    in_channels = 16
    out_channels = 256          # hidden dims: 8, 16, 32, 64, 128, 256

    key = jax.random.PRNGKey(0)
    key, kp = jax.random.split(key)
    params = init_params(kp, in_channels, out_channels)

    def make_inputs(k, n_rows):
        ks = jax.random.split(k, 6)
        x_in = jax.random.normal(ks[0], (n_rows, in_channels), jnp.float32)
        x5_e = jax.random.normal(ks[1], (n_rows, out_channels // 32), jnp.float32)
        x4_e = jax.random.normal(ks[2], (n_rows, out_channels // 16), jnp.float32)
        x3_e = jax.random.normal(ks[3], (n_rows, out_channels // 8), jnp.float32)
        x2_e = jax.random.normal(ks[4], (n_rows, out_channels // 4), jnp.float32)
        x1_e = jax.random.normal(ks[5], (n_rows, out_channels // 2), jnp.float32)  # unused
        return x1_e, x2_e, x3_e, x4_e, x5_e, x_in

    # 1) Small batch: single grid point (no pipelining overhead), exact f32 matmuls.
    key, k1 = jax.random.split(key)
    args_small = make_inputs(k1, 16)
    out = jax.block_until_ready(decoder_forward(*args_small, params))
    ref = decoder_ref(*args_small, params)
    assert out.shape == (16, out_channels)
    assert jnp.allclose(out, ref, atol=1e-4, rtol=1e-4)

    # 2) Larger batch: tiled grid (>=2 steps so both v7x TCs get work) + bf16 MXU inputs.
    key, k2 = jax.random.split(key)
    args_big = make_inputs(k2, 256)
    out_bf = jax.block_until_ready(
        decoder_forward(*args_big, params, row_tile=128, use_bf16_matmul=True))
    ref_bf = decoder_ref(*args_big, params)
    assert out_bf.shape == (256, out_channels)
    assert jnp.allclose(out_bf, ref_bf, atol=1e-1, rtol=1e-1)

    print("KERNEL_OK")
</pallas_src>

<mosaic_0001>
module attributes {stable_mosaic.version = 11 : i64} {
  func.func @_decoder_kernel(%arg0: i32, %arg1: memref<16x136xf32, #tpu.memory_space<vmem>>, %arg2: memref<16x8xf32, #tpu.memory_space<vmem>>, %arg3: memref<1x8xf32, #tpu.memory_space<vmem>>, %arg4: memref<8x16xf32, #tpu.memory_space<vmem>>, %arg5: memref<1x16xf32, #tpu.memory_space<vmem>>, %arg6: memref<16x32xf32, #tpu.memory_space<vmem>>, %arg7: memref<1x32xf32, #tpu.memory_space<vmem>>, %arg8: memref<32x64xf32, #tpu.memory_space<vmem>>, %arg9: memref<1x64xf32, #tpu.memory_space<vmem>>, %arg10: memref<64x128xf32, #tpu.memory_space<vmem>>, %arg11: memref<1x128xf32, #tpu.memory_space<vmem>>, %arg12: memref<128x256xf32, #tpu.memory_space<vmem>>, %arg13: memref<1x256xf32, #tpu.memory_space<vmem>>, %arg14: memref<16x256xf32, #tpu.memory_space<vmem>>) attributes {dimension_semantics = [#tpu.dimension_semantics<parallel>], iteration_bounds = array<i64: 1>, scalar_prefetch = 0 : i64, scratch_operands = 0 : i64, tpu.core_type = #tpu.core_type<tc>, window_params = [{transform_indices = @transform_0, window_bounds = array<i64: 16, 136>}, {pipeline_mode = #tpu.pipeline_mode<synchronous>, transform_indices = @transform_1, window_bounds = array<i64: 16, 8>}, {pipeline_mode = #tpu.pipeline_mode<synchronous>, transform_indices = @transform_2, window_bounds = array<i64: 1, 8>}, {pipeline_mode = #tpu.pipeline_mode<synchronous>, transform_indices = @transform_3, window_bounds = array<i64: 8, 16>}, {pipeline_mode = #tpu.pipeline_mode<synchronous>, transform_indices = @transform_4, window_bounds = array<i64: 1, 16>}, {pipeline_mode = #tpu.pipeline_mode<synchronous>, transform_indices = @transform_5, window_bounds = array<i64: 16, 32>}, {pipeline_mode = #tpu.pipeline_mode<synchronous>, transform_indices = @transform_6, window_bounds = array<i64: 1, 32>}, {pipeline_mode = #tpu.pipeline_mode<synchronous>, transform_indices = @transform_7, window_bounds = array<i64: 32, 64>}, {pipeline_mode = #tpu.pipeline_mode<synchronous>, transform_indices = @transform_8, window_bounds = array<i64: 1, 64>}, {pipeline_mode = #tpu.pipeline_mode<synchronous>, transform_indices = @transform_9, window_bounds = array<i64: 64, 128>}, {pipeline_mode = #tpu.pipeline_mode<synchronous>, transform_indices = @transform_10, window_bounds = array<i64: 1, 128>}, {pipeline_mode = #tpu.pipeline_mode<synchronous>, transform_indices = @transform_11, window_bounds = array<i64: 128, 256>}, {pipeline_mode = #tpu.pipeline_mode<synchronous>, transform_indices = @transform_12, window_bounds = array<i64: 1, 256>}, {transform_indices = @transform_13, window_bounds = array<i64: 16, 256>}]} {
    %c0 = arith.constant 0 : index
    %c0_0 = arith.constant 0 : index
    %0 = vector.load %arg1[%c0, %c0_0] : memref<16x136xf32, #tpu.memory_space<vmem>>, vector<16x136xf32>
    %1 = vector.extract_strided_slice %0 {offsets = [0, 0], sizes = [16, 64], strides = [1, 1]} : vector<16x136xf32> to vector<16x64xf32>
    %2 = vector.extract_strided_slice %0 {offsets = [0, 64], sizes = [16, 32], strides = [1, 1]} : vector<16x136xf32> to vector<16x32xf32>
    %3 = vector.extract_strided_slice %0 {offsets = [0, 96], sizes = [16, 16], strides = [1, 1]} : vector<16x136xf32> to vector<16x16xf32>
    %4 = vector.extract_strided_slice %0 {offsets = [0, 112], sizes = [16, 16], strides = [1, 1]} : vector<16x136xf32> to vector<16x16xf32>
    %5 = vector.extract_strided_slice %0 {offsets = [0, 128], sizes = [16, 8], strides = [1, 1]} : vector<16x136xf32> to vector<16x8xf32>
    %c0_1 = arith.constant 0 : index
    %c0_2 = arith.constant 0 : index
    %6 = vector.load %arg2[%c0_1, %c0_2] : memref<16x8xf32, #tpu.memory_space<vmem>>, vector<16x8xf32>
    %cst = arith.constant dense<0.000000e+00> : vector<16x8xf32>
    %7 = tpu.matmul %3, %6, %cst {dimension_numbers = #tpu.dot_dimension_numbers<[1], [0], [0], [1], [0, 0, 1, 1], [], []>} : vector<16x16xf32>, vector<16x8xf32>, vector<16x8xf32> -> vector<16x8xf32>
    %c0_3 = arith.constant 0 : index
    %c0_4 = arith.constant 0 : index
    %8 = vector.load %arg3[%c0_3, %c0_4] : memref<1x8xf32, #tpu.memory_space<vmem>>, vector<1x8xf32>
    %9 = vector.broadcast %8 : vector<1x8xf32> to vector<16x8xf32>
    %10 = arith.addf %7, %9 : vector<16x8xf32>
    %cst_5 = arith.constant 0.000000e+00 : f32
    %11 = vector.broadcast %cst_5 : f32 to vector<16x8xf32>
    %12 = arith.maximumf %10, %11 : vector<16x8xf32>
    %13 = arith.addf %12, %5 : vector<16x8xf32>
    %c0_6 = arith.constant 0 : index
    %c0_7 = arith.constant 0 : index
    %14 = vector.load %arg4[%c0_6, %c0_7] : memref<8x16xf32, #tpu.memory_space<vmem>>, vector<8x16xf32>
    %cst_8 = arith.constant dense<0.000000e+00> : vector<16x16xf32>
    %15 = tpu.matmul %13, %14, %cst_8 {dimension_numbers = #tpu.dot_dimension_numbers<[1], [0], [0], [1], [0, 0, 1, 1], [], []>} : vector<16x8xf32>, vector<8x16xf32>, vector<16x16xf32> -> vector<16x16xf32>
    %c0_9 = arith.constant 0 : index
    %c0_10 = arith.constant 0 : index
    %16 = vector.load %arg5[%c0_9, %c0_10] : memref<1x16xf32, #tpu.memory_space<vmem>>, vector<1x16xf32>
    %17 = vector.broadcast %16 : vector<1x16xf32> to vector<16x16xf32>
    %18 = arith.addf %15, %17 : vector<16x16xf32>
    %cst_11 = arith.constant 0.000000e+00 : f32
    %19 = vector.broadcast %cst_11 : f32 to vector<16x16xf32>
    %20 = arith.maximumf %18, %19 : vector<16x16xf32>
    %21 = arith.addf %20, %4 : vector<16x16xf32>
    %c0_12 = arith.constant 0 : index
    %c0_13 = arith.constant 0 : index
    %22 = vector.load %arg6[%c0_12, %c0_13] : memref<16x32xf32, #tpu.memory_space<vmem>>, vector<16x32xf32>
    %cst_14 = arith.constant dense<0.000000e+00> : vector<16x32xf32>
    %23 = tpu.matmul %21, %22, %cst_14 {dimension_numbers = #tpu.dot_dimension_numbers<[1], [0], [0], [1], [0, 0, 1, 1], [], []>} : vector<16x16xf32>, vector<16x32xf32>, vector<16x32xf32> -> vector<16x32xf32>
    %c0_15 = arith.constant 0 : index
    %c0_16 = arith.constant 0 : index
    %24 = vector.load %arg7[%c0_15, %c0_16] : memref<1x32xf32, #tpu.memory_space<vmem>>, vector<1x32xf32>
    %25 = vector.broadcast %24 : vector<1x32xf32> to vector<16x32xf32>
    %26 = arith.addf %23, %25 : vector<16x32xf32>
    %cst_17 = arith.constant 0.000000e+00 : f32
    %27 = vector.broadcast %cst_17 : f32 to vector<16x32xf32>
    %28 = arith.maximumf %26, %27 : vector<16x32xf32>
    %29 = arith.addf %28, %2 : vector<16x32xf32>
    %c0_18 = arith.constant 0 : index
    %c0_19 = arith.constant 0 : index
    %30 = vector.load %arg8[%c0_18, %c0_19] : memref<32x64xf32, #tpu.memory_space<vmem>>, vector<32x64xf32>
    %cst_20 = arith.constant dense<0.000000e+00> : vector<16x64xf32>
    %31 = tpu.matmul %29, %30, %cst_20 {dimension_numbers = #tpu.dot_dimension_numbers<[1], [0], [0], [1], [0, 0, 1, 1], [], []>} : vector<16x32xf32>, vector<32x64xf32>, vector<16x64xf32> -> vector<16x64xf32>
    %c0_21 = arith.constant 0 : index
    %c0_22 = arith.constant 0 : index
    %32 = vector.load %arg9[%c0_21, %c0_22] : memref<1x64xf32, #tpu.memory_space<vmem>>, vector<1x64xf32>
    %33 = vector.broadcast %32 : vector<1x64xf32> to vector<16x64xf32>
    %34 = arith.addf %31, %33 : vector<16x64xf32>
    %cst_23 = arith.constant 0.000000e+00 : f32
    %35 = vector.broadcast %cst_23 : f32 to vector<16x64xf32>
    %36 = arith.maximumf %34, %35 : vector<16x64xf32>
    %37 = arith.addf %36, %1 : vector<16x64xf32>
    %c0_24 = arith.constant 0 : index
    %c0_25 = arith.constant 0 : index
    %38 = vector.load %arg10[%c0_24, %c0_25] : memref<64x128xf32, #tpu.memory_space<vmem>>, vector<64x128xf32>
    %cst_26 = arith.constant dense<0.000000e+00> : vector<16x128xf32>
    %39 = tpu.matmul %37, %38, %cst_26 {dimension_numbers = #tpu.dot_dimension_numbers<[1], [0], [0], [1], [0, 0, 1, 1], [], []>} : vector<16x64xf32>, vector<64x128xf32>, vector<16x128xf32> -> vector<16x128xf32>
    %c0_27 = arith.constant 0 : index
    %c0_28 = arith.constant 0 : index
    %40 = vector.load %arg11[%c0_27, %c0_28] : memref<1x128xf32, #tpu.memory_space<vmem>>, vector<1x128xf32>
    %41 = vector.broadcast %40 : vector<1x128xf32> to vector<16x128xf32>
    %42 = arith.addf %39, %41 : vector<16x128xf32>
    %cst_29 = arith.constant 0.000000e+00 : f32
    %43 = vector.broadcast %cst_29 : f32 to vector<16x128xf32>
    %44 = arith.maximumf %42, %43 : vector<16x128xf32>
    %c0_30 = arith.constant 0 : index
    %c0_31 = arith.constant 0 : index
    %45 = vector.load %arg12[%c0_30, %c0_31] : memref<128x256xf32, #tpu.memory_space<vmem>>, vector<128x256xf32>
    %cst_32 = arith.constant dense<0.000000e+00> : vector<16x256xf32>
    %46 = tpu.matmul %44, %45, %cst_32 {dimension_numbers = #tpu.dot_dimension_numbers<[1], [0], [0], [1], [0, 0, 1, 1], [], []>} : vector<16x128xf32>, vector<128x256xf32>, vector<16x256xf32> -> vector<16x256xf32>
    %c0_33 = arith.constant 0 : index
    %c0_34 = arith.constant 0 : index
    %47 = vector.load %arg13[%c0_33, %c0_34] : memref<1x256xf32, #tpu.memory_space<vmem>>, vector<1x256xf32>
    %48 = vector.broadcast %47 : vector<1x256xf32> to vector<16x256xf32>
    %49 = arith.addf %46, %48 : vector<16x256xf32>
    %c0_35 = arith.constant 0 : index
    %c0_36 = arith.constant 0 : index
    %50 = vector.load %arg14[%c0_35, %c0_36] : memref<16x256xf32, #tpu.memory_space<vmem>>, vector<16x256xf32>
    tpu.vector_store %arg14[%c0_35, %c0_36], %49 {strides = array<i32>} : memref<16x256xf32, #tpu.memory_space<vmem>>, vector<16x256xf32>,
    return
  }
  func.func @transform_0(%arg0: i32) -> (i32, i32) {
    %c0_i32 = arith.constant 0 : i32
    %c0_i32_0 = arith.constant 0 : i32
    return %arg0, %c0_i32 : i32, i32
  }
  func.func @transform_1(%arg0: i32) -> (i32, i32) {
    %c0_i32 = arith.constant 0 : i32
    %c0_i32_0 = arith.constant 0 : i32
    %c0_i32_1 = arith.constant 0 : i32
    return %c0_i32, %c0_i32_0 : i32, i32
  }
  func.func @transform_2(%arg0: i32) -> (i32, i32) {
    %c0_i32 = arith.constant 0 : i32
    %c0_i32_0 = arith.constant 0 : i32
    %c0_i32_1 = arith.constant 0 : i32
    return %c0_i32, %c0_i32_0 : i32, i32
  }
  func.func @transform_3(%arg0: i32) -> (i32, i32) {
    %c0_i32 = arith.constant 0 : i32
    %c0_i32_0 = arith.constant 0 : i32
    %c0_i32_1 = arith.constant 0 : i32
    return %c0_i32, %c0_i32_0 : i32, i32
  }
  func.func @transform_4(%arg0: i32) -> (i32, i32) {
    %c0_i32 = arith.constant 0 : i32
    %c0_i32_0 = arith.constant 0 : i32
    %c0_i32_1 = arith.constant 0 : i32
    return %c0_i32, %c0_i32_0 : i32, i32
  }
  func.func @transform_5(%arg0: i32) -> (i32, i32) {
    %c0_i32 = arith.constant 0 : i32
    %c0_i32_0 = arith.constant 0 : i32
    %c0_i32_1 = arith.constant 0 : i32
    return %c0_i32, %c0_i32_0 : i32, i32
  }
  func.func @transform_6(%arg0: i32) -> (i32, i32) {
    %c0_i32 = arith.constant 0 : i32
    %c0_i32_0 = arith.constant 0 : i32
    %c0_i32_1 = arith.constant 0 : i32
    return %c0_i32, %c0_i32_0 : i32, i32
  }
  func.func @transform_7(%arg0: i32) -> (i32, i32) {
    %c0_i32 = arith.constant 0 : i32
    %c0_i32_0 = arith.constant 0 : i32
    %c0_i32_1 = arith.constant 0 : i32
    return %c0_i32, %c0_i32_0 : i32, i32
  }
  func.func @transform_8(%arg0: i32) -> (i32, i32) {
    %c0_i32 = arith.constant 0 : i32
    %c0_i32_0 = arith.constant 0 : i32
    %c0_i32_1 = arith.constant 0 : i32
    return %c0_i32, %c0_i32_0 : i32, i32
  }
  func.func @transform_9(%arg0: i32) -> (i32, i32) {
    %c0_i32 = arith.constant 0 : i32
    %c0_i32_0 = arith.constant 0 : i32
    %c0_i32_1 = arith.constant 0 : i32
    return %c0_i32, %c0_i32_0 : i32, i32
  }
  func.func @transform_10(%arg0: i32) -> (i32, i32) {
    %c0_i32 = arith.constant 0 : i32
    %c0_i32_0 = arith.constant 0 : i32
    %c0_i32_1 = arith.constant 0 : i32
    return %c0_i32, %c0_i32_0 : i32, i32
  }
  func.func @transform_11(%arg0: i32) -> (i32, i32) {
    %c0_i32 = arith.constant 0 : i32
    %c0_i32_0 = arith.constant 0 : i32
    %c0_i32_1 = arith.constant 0 : i32
    return %c0_i32, %c0_i32_0 : i32, i32
  }
  func.func @transform_12(%arg0: i32) -> (i32, i32) {
    %c0_i32 = arith.constant 0 : i32
    %c0_i32_0 = arith.constant 0 : i32
    %c0_i32_1 = arith.constant 0 : i32
    return %c0_i32, %c0_i32_0 : i32, i32
  }
  func.func @transform_13(%arg0: i32) -> (i32, i32) {
    %c0_i32 = arith.constant 0 : i32
    %c0_i32_0 = arith.constant 0 : i32
    return %arg0, %c0_i32 : i32, i32
  }
}

</mosaic_0001>

<bundles_post_ra>
// kernel: tpu_custom_call.1
= control target key start
LH: loop header
LB: loop body
LE: loop exit
PB: predicated region body
PF: predicated region fallthrough
CT: control target
= control target key end

     0   :  { %18 = vsyncpa [#allocation3], 0  ;;  %s1373_s0 = inlined_call_operand.hbm [shape: f32[16,136], index: 0, kind: input, shape index: {}]   ;;  %s1374_s1 = inlined_call_operand.vmem [shape: f32[16,8], index: 1, kind: input, shape index: {}]   ;;  %s1375_s2 = inlined_call_operand.hbm [shape: f32[1,8], index: 2, kind: input, shape index: {}]   ;;  %s1376_s3 = inlined_call_operand.hbm [shape: f32[8,16], index: 3, kind: input, shape index: {}]   ;;  %s1377_s4 = inlined_call_operand.hbm [shape: f32[1,16], index: 4, kind: input, shape index: {}]   ;;  %s1378_s5 = inlined_call_operand.vmem [shape: f32[16,32], index: 5, kind: input, shape index: {}]   ;;  %s1379_s6 = inlined_call_operand.hbm [shape: f32[1,32], index: 6, kind: input, shape index: {}]   ;;  %s1380_s7 = inlined_call_operand.vmem [shape: f32[32,64], index: 7, kind: input, shape index: {}]   ;;  %s1381_s8 = inlined_call_operand.vmem [shape: f32[1,64], index: 8, kind: input, shape index: {}]   ;;  %s1382_s9 = inlined_call_operand.hbm [shape: f32[64,128], index: 9, kind: input, shape index: {}]   ;;  %s1383_s10 = inlined_call_operand.vmem [shape: f32[1,128], index: 10, kind: input, shape index: {}]   ;;  %s1384_s11 = inlined_call_operand.hbm [shape: f32[128,256], index: 11, kind: input, shape index: {}]   ;;  %s1385_s12 = inlined_call_operand.vmem [shape: f32[1,256], index: 12, kind: input, shape index: {}]   ;;  %s1386_s13 = inlined_call_operand.hbm [shape: f32[16,256], index: 13, kind: output, shape index: {}]  }
   0x1   :  { %19 = vsyncpa [#allocation6], 0 }
   0x2   :  { %20 = vsyncpa [#allocation9], 0 }
   0x3   :  { %21 = vsyncpa [#allocation12], 0 }
   0x4   :  { %22 = vsyncpa [#allocation4], 0  ;;  %s1132_s25 = smov [#allocation5]   ;;  %s1133_s27 = smov [#allocation8]  }
   0x5   :  { %s43_s26 = sshll.u32 %s1132_s25, 4  ;;  %s63_s28 = sshll.u32 %s1133_s27, 4  ;;  %s44_s26 = int_to_ptr.vmem [resolvable:$true] %s43_s26  ;;  %s64_s28 = int_to_ptr.vmem [resolvable:$true] %s63_s28 }
   0x6   :  { %s946_s14 = scalar_lea.hbm %s1375_s2, 16 }
   0x7   :  { %p947_p0 = scmp.ne.s32.totalorder %s1375_s2, %s946_s14  ;;  %p950_p1 = scmp.lt.u32.totalorder %s946_s14, %s1375_s2 }
   0x9   :  { %p952_p2 = pnand %p950_p1, %p947_p0 }
   0xb   :  { %955 = shalt.err (!%p952_p2)
}
   0xc   :  { %s956_s19 = scalar_lea.vmem %s44_s26, 16  ;;  %s960_s20 = scalar_lea.vmem %s44_s26, 32 }
   0xd   :  { %p957_p3 = scmp.ne.s32.totalorder %s44_s26, %s956_s19  ;;  %p961_p4 = scmp.lt.s32.totalorder %s44_s26, %s44_s26 }
   0xe   :  { %p962_p5 = scmp.lt.s32.totalorder %s960_s20, %s956_s19 }
  0x10   :  { %p963_p6 = por %p962_p5, %p961_p4 }
  0x12   :  { %p964_p7 = pnand %p963_p6, %p957_p3 }
  0x14   :  { %967 = shalt.err (!%p964_p7)
}
  0x15   :  { %46 = dma.hbm_to_vmem [thread:$0]  %s1375_s2, 16, %s44_s26, [#allocation6]  }
  0x16   :  { %s968_s25 = scalar_lea.hbm %s1377_s4, 16 }
  0x17   :  { %p969_p8 = scmp.ne.s32.totalorder %s1377_s4, %s968_s25  ;;  %p972_p9 = scmp.lt.u32.totalorder %s968_s25, %s1377_s4 }
  0x19   :  { %p974_p10 = pnand %p972_p9, %p969_p8 }
  0x1b   :  { %977 = shalt.err (!%p974_p10)
}
  0x1c   :  { %s978_s15 = scalar_lea.vmem %s64_s28, 16  ;;  %s982_s16 = scalar_lea.vmem %s64_s28, 32 }
  0x1d   :  { %p979_p11 = scmp.ne.s32.totalorder %s64_s28, %s978_s15  ;;  %p983_p12 = scmp.lt.s32.totalorder %s64_s28, %s64_s28 }
  0x1e   :  { %p984_p13 = scmp.lt.s32.totalorder %s982_s16, %s978_s15 }
  0x20   :  { %p985_p0 = por %p984_p13, %p983_p12 }
  0x22   :  { %p986_p1 = pnand %p985_p0, %p979_p11 }
  0x24   :  { %989 = shalt.err (!%p986_p1)
}
  0x25   :  { %66 = dma.hbm_to_vmem [thread:$0]  %s1377_s4, 16, %s64_s28, [#allocation9]  }
  0x26   :  { %s1134_s17 = smov [#allocation11]   ;;  %s990_s21 = scalar_lea.hbm %s1382_s9, 1024 }
  0x27   :  { %s88_s18 = sshll.u32 %s1134_s17, 4  ;;  %p991_p2 = scmp.ne.s32.totalorder %s1382_s9, %s990_s21  ;;  %s89_s18 = int_to_ptr.vmem [resolvable:$true] %s88_s18 }
  0x28   :  { %p994_p3 = scmp.lt.u32.totalorder %s990_s21, %s1382_s9 }
  0x2a   :  { %p996_p4 = pnand %p994_p3, %p991_p2 }
  0x2c   :  { %999 = shalt.err (!%p996_p4)
}
  0x2d   :  { %s1000_s27 = scalar_lea.vmem %s89_s18, 1024  ;;  %p1005_p6 = scmp.lt.s32.totalorder %s89_s18, %s89_s18 }
  0x2e   :  { %p1001_p5 = scmp.ne.s32.totalorder %s89_s18, %s1000_s27  ;;  %p1006_p7 = scmp.lt.s32.totalorder %s1000_s27, %s1000_s27 }
  0x30   :  { %p1007_p8 = por %p1006_p7, %p1005_p6 }
  0x32   :  { %p1008_p9 = pnand %p1007_p8, %p1001_p5 }
  0x34   :  { %1011 = shalt.err (!%p1008_p9)
}
  0x35   :  { %s1135_s4 = smov 128   ;;  %s1136_s28 = smov 8  }
  0x36   :  { %94 = dma.hbm_to_vmem [thread:$0]  %s1382_s9, 1024, %s89_s18, [#allocation12], %s1135_s4, %s1135_s4, %s1136_s28  }
  0x37   :  { %s1137_s14 = smov [#allocation2]   ;;  %s1012_s26 = scalar_lea.hbm %s1373_s0, 512 }
  0x38   :  { %s28_s15 = sshll.u32 %s1137_s14, 4  ;;  %p1013_p10 = scmp.ne.s32.totalorder %s1373_s0, %s1012_s26  ;;  %s29_s15 = int_to_ptr.vmem [resolvable:$true] %s28_s15 }
  0x39   :  { %p1016_p11 = scmp.lt.u32.totalorder %s1012_s26, %s1373_s0 }
  0x3b   :  { %p1018_p12 = pnand %p1016_p11, %p1013_p10 }
  0x3d   :  { %1021 = shalt.err (!%p1018_p12)
}
  0x3e   :  { %s1022_s22 = scalar_lea.vmem %s29_s15, 512  ;;  %p1027_p0 = scmp.lt.s32.totalorder %s29_s15, %s29_s15 }
  0x3f   :  { %p1023_p13 = scmp.ne.s32.totalorder %s29_s15, %s1022_s22  ;;  %p1028_p1 = scmp.lt.s32.totalorder %s1022_s22, %s1022_s22 }
  0x41   :  { %p1029_p2 = por %p1028_p1, %p1027_p0 }
  0x43   :  { %p1030_p3 = pnand %p1029_p2, %p1023_p13 }
  0x45   :  { %1033 = shalt.err (!%p1030_p3)
}
  0x46   :  { %s1138_s9 = smov 256   ;;  %s1139_s18 = smov 16  }
  0x47   :  { %34 = dma.hbm_to_vmem [thread:$0]  %s1373_s0, 512, %s29_s15, [#allocation3], %s1138_s9, %s1138_s9, %s1139_s18  }
  0x48   :  { %s1140_s25 = smov [#allocation7]   ;;  %s1141_s4 = smov [#allocation10]  }
  0x49   :  { %s53_s27 = sshll.u32 %s1140_s25, 4  ;;  %s75_s28 = sshll.u32 %s1141_s4, 4  ;;  %s54_s27 = int_to_ptr.vmem [resolvable:$true] %s53_s27  ;;  %s76_s28 = int_to_ptr.vmem [resolvable:$true] %s75_s28 }
  0x4a   :  { %s1034_s14 = scalar_lea.hbm %s1376_s3, 128 }
  0x4b   :  { %p1035_p4 = scmp.ne.s32.totalorder %s1376_s3, %s1034_s14  ;;  %p1038_p5 = scmp.lt.u32.totalorder %s1034_s14, %s1376_s3 }
  0x4d   :  { %p1040_p6 = pnand %p1038_p5, %p1035_p4 }
  0x4f   :  { %1043 = shalt.err (!%p1040_p6)
}
  0x50   :  { %s1044_s0 = scalar_lea.vmem %s54_s27, 128  ;;  %p1049_p8 = scmp.lt.s32.totalorder %s54_s27, %s54_s27 }
  0x51   :  { %p1045_p7 = scmp.ne.s32.totalorder %s54_s27, %s1044_s0  ;;  %p1050_p9 = scmp.lt.s32.totalorder %s1044_s0, %s1044_s0 }
  0x53   :  { %p1051_p10 = por %p1050_p9, %p1049_p8 }
  0x55   :  { %p1052_p11 = pnand %p1051_p10, %p1045_p7 }
  0x57   :  { %1055 = shalt.err (!%p1052_p11)
}
  0x58   :  { %56 = dma.hbm_to_vmem [thread:$0]  %s1376_s3, 128, %s54_s27, [#allocation6]  }
  0x59   :  { %s1056_s22 = scalar_lea.hbm %s1379_s6, 16 }
  0x5a   :  { %p1057_p12 = scmp.ne.s32.totalorder %s1379_s6, %s1056_s22  ;;  %p1060_p13 = scmp.lt.u32.totalorder %s1056_s22, %s1379_s6 }
  0x5c   :  { %p1062_p0 = pnand %p1060_p13, %p1057_p12 }
  0x5e   :  { %1065 = shalt.err (!%p1062_p0)
}
  0x5f   :  { %s1066_s29 = scalar_lea.vmem %s76_s28, 16  ;;  %s1070_s30 = scalar_lea.vmem %s76_s28, 32 }
  0x60   :  { %p1067_p1 = scmp.ne.s32.totalorder %s76_s28, %s1066_s29  ;;  %p1071_p2 = scmp.lt.s32.totalorder %s76_s28, %s76_s28 }
  0x61   :  { %p1072_p3 = scmp.lt.s32.totalorder %s1070_s30, %s1066_s29 }
  0x63   :  { %p1073_p4 = por %p1072_p3, %p1071_p2 }
  0x65   :  { %p1074_p5 = pnand %p1073_p4, %p1067_p1 }
  0x67   :  { %1077 = shalt.err (!%p1074_p5)
}
  0x68   :  { %78 = dma.hbm_to_vmem [thread:$0]  %s1379_s6, 16, %s76_s28, [#allocation9]  }
  0x69   :  { %s1142_s14 = smov [#allocation13]   ;;  %s1078_s17 = scalar_lea.hbm %s1384_s11, 4096 }
  0x6a   :  { %s102_s16 = sshll.u32 %s1142_s14, 4  ;;  %p1079_p6 = scmp.ne.s32.totalorder %s1384_s11, %s1078_s17  ;;  %s103_s16 = int_to_ptr.vmem [resolvable:$true] %s102_s16 }
  0x6b   :  { %p1082_p7 = scmp.lt.u32.totalorder %s1078_s17, %s1384_s11 }
  0x6d   :  { %p1084_p8 = pnand %p1082_p7, %p1079_p6 }
  0x6f   :  { %1087 = shalt.err (!%p1084_p8)
}
  0x70   :  { %s1088_s21 = scalar_lea.vmem %s103_s16, 4096  ;;  %p1093_p10 = scmp.lt.s32.totalorder %s103_s16, %s103_s16 }
  0x71   :  { %p1089_p9 = scmp.ne.s32.totalorder %s103_s16, %s1088_s21  ;;  %p1094_p11 = scmp.lt.s32.totalorder %s1088_s21, %s1088_s21 }
  0x73   :  { %p1095_p12 = por %p1094_p11, %p1093_p10 }
  0x75   :  { %p1096_p13 = pnand %p1095_p12, %p1089_p9 }
  0x77   :  { %1099 = shalt.err (!%p1096_p13)
}
  0x78   :  { %108 = dma.hbm_to_vmem [thread:$0]  %s1384_s11, 4096, %s103_s16, [#allocation12], %s1138_s9, %s1138_s9, %s1139_s18  }
  0x79   :  { %1122 = dma.done.wait [#allocation3], 512  }
  0x7a   :  { %1123 = vsyncadd [#allocation3], 4294966784 }
  0x7b   :  { %1124 = dma.done.wait [#allocation6], 144  }
  0x7c   :  { %1125 = vsyncadd [#allocation6], 4294967152 }
  0x7d   :  { %1126 = dma.done.wait [#allocation9], 32  }
  0x7e   :  { %1127 = vsyncadd [#allocation9], 4294967264 }
  0x7f   :  { %1128 = dma.done.wait [#allocation12], 5120  }
  0x80   :  { %1129 = vsyncadd [#allocation12], 4294962176  ;;  %v1307_v0 = vld [vmem:[#allocation2] sm:$0xff]  ;;  %s1143_s24 = smov 32   ;;  %v137_v2 = vld [vmem:[%s1374_s1 + $0x8] sm:$0xff]  ;;  %vm151_vm0 = vcmask 130048  }
  0x81   :  { %v136_v1 = vld [vmem:[%s1374_s1] sm:$0xff]  ;;  %147 = vrot.lane.b32.xlu0 %v1307_v0, %s1143_s24  ;;  %327 = vrot.lane.b32.xlu1 %v1307_v0, %s1139_s18  ;;  %v1318_v3 = vld [vmem:[#allocation2 + $0x10] sm:$0xff]  ;;  %v133_v14 = vld [vmem:[#allocation2 + $0x8] sm:$0xff]  ;;  %vm243_vm1 = vcmask 64512   ;;  %s1144_s3 = smov 64   ;;  %vm446_vm2 = vcmask 261120  }
  0x82   :  { %v867_v4 = vpack.c.bf16 %v137_v2, %v136_v1  ;;  %v235_v7 = vld [vmem:[#allocation7] sm:$0xff]  ;;  %v776_v8 = vld [vmem:[#allocation5] ss:$0 sm:$0xff]  ;;  %v135_v15 = vld [vmem:[#allocation2 + $0x18] sm:$0xff]  ;;  %vm547_vm3 = vcmask 523264  }
  0x83   :  { %v335_v19 = vld [vmem:[%s1378_s5] sm:$0xff]  ;;  %v336_v20 = vld [vmem:[%s1378_s5 + $0x8] sm:$0xff]  ;;  %v437_v36 = vld [vmem:[%s1380_s7 + $0x10] sm:$0xff] }
  0x84   :  { %868 = vmatprep.subr.bf16.mxu1 %v867_v4  ;;  %v871_v21 = vpack.c.bf16 %v336_v20, %v335_v19  ;;  %v779_v23 = vld [vmem:[#allocation8] ss:$0 sm:$0xff]  ;;  %v435_v33 = vld [vmem:[%s1380_s7] sm:$0xff]  ;;  %v438_v37 = vld [vmem:[%s1380_s7 + $0x18] sm:$0xff] }
  0x85   :  { %149 = vrot.lane.b32.xlu0 %v1318_v3, %s1143_s24  ;;  %870 = vmatpush3.bf16.msra.mxu1 %v867_v4  ;;  %v436_v34 = vld [vmem:[%s1380_s7 + $0x8] sm:$0xff]  ;;  %v879_v38 = vpack.c.bf16 %v438_v37, %v437_v36  ;;  %v533_v40 = vld [vmem:[#allocation11 + $0x8] sm:$0xff]  ;;  %v534_v51 = vld [vmem:[#allocation11 + $0x10] sm:$0xff] }
  0x86   :  { %329 = vrot.lane.b32.xlu1 %v1318_v3, %s1139_s18  ;;  %825 = vmatprep.subr.mxu1 %v235_v7  ;;  %v875_v35 = vpack.c.bf16 %v436_v34, %v435_v33  ;;  %v532_v39 = vld [vmem:[#allocation11] sm:$0xff]  ;;  %v782_v42 = vld [vmem:[#allocation10] ss:$0 sm:$0xff]  ;;  %v537_v57 = vld [vmem:[#allocation11 + $0x28] sm:$0xff] }
  0x87   :  { %v883_v41 = vpack.c.bf16 %v533_v40, %v532_v39  ;;  %v535_v52 = vld [vmem:[#allocation11 + $0x18] sm:$0xff]  ;;  %v536_v56 = vld [vmem:[#allocation11 + $0x20] sm:$0xff]  ;;  %v538_v59 = vld [vmem:[#allocation11 + $0x30] sm:$0xff] }
  0x88   :  { %v887_v55 = vpack.c.bf16 %v535_v52, %v534_v51  ;;  %v891_v58 = vpack.c.bf16 %v537_v57, %v536_v56  ;;  %v539_v60 = vld [vmem:[#allocation11 + $0x38] sm:$0xff]  ;;  %v632_v62 = vld [vmem:[#allocation13 + $0x8] sm:$0xff]  ;;  %v631_v1 = vld [vmem:[#allocation13] sm:$0xff]  ;;  %v1145_v57 = vmov 0.0  }
  0x89   :  { %427 = vrot.lane.b32.xlu0 %v1307_v0, %s1144_s3  ;;  %v895_v61 = vpack.c.bf16 %v539_v60, %v538_v59  ;;  %v634_v63 = vld [vmem:[#allocation13 + $0x18] sm:$0xff]  ;;  %v633_v4 = vld [vmem:[#allocation13 + $0x10] sm:$0xff]  ;;  %v651_v33 = vld [vmem:[#allocation13 + $0xa0] sm:$0xff]  ;;  %739 = vmatprep.mubr.f32.mxu0 %v1145_v57 }
  0x8a   :  { %429 = vrot.lane.b32.xlu1 %v1318_v3, %s1144_s3  ;;  %v899_v2 = vpack.c.bf16 %v634_v63, %v632_v62  ;;  %v653_v34 = vld [vmem:[#allocation13 + $0xb0] sm:$0xff]  ;;  %v658_v36 = vld [vmem:[#allocation13 + $0xd8] sm:$0xff]  ;;  %v655_v39 = vld [vmem:[#allocation13 + $0xc0] sm:$0xff]  ;;  %v665_v63 = vlaneseq }
  0x8b   :  { %v921_v37 = vpack.c.bf16 %v653_v34, %v651_v33  ;;  %v657_v40 = vld [vmem:[#allocation13 + $0xd0] sm:$0xff]  ;;  %v660_v51 = vld [vmem:[#allocation13 + $0xe8] sm:$0xff]  ;;  %v662_v52 = vld [vmem:[#allocation13 + $0xf8] sm:$0xff] }
  0x8c   :  { %900 = vmatprep.subr.bf16.mxu0 %v899_v2 }
  0xf3   :  { %v148_v5 = vpop.permute.xlu0 %147  ;;  %v328_v22 = vpop.permute.xlu1 %327 }
  0xf4   :  { %822 = vmatprep.mubr.msk.f32.mxu1 %vm151_vm0, %v148_v5  ;;  %v636_v5 = vld [vmem:[#allocation13 + $0x28] sm:$0xff] }
  0xf7   :  { %v150_v6 = vpop.permute.xlu0 %149 }
  0xf8   :  { %823 = vmatmul.mubr.msk.f32.vlgmr.msra.gmra.mrb[0].mxu1 %vm151_vm0, %v150_v6  ;;  %v330_v30 = vpop.permute.xlu1 %329  ;;  %v638_v6 = vld [vmem:[#allocation13 + $0x38] sm:$0xff] }
  0xf9   :  { %826 = vmatpush3.msra.mxu1 %v235_v7  ;;  %v901_v7 = vpack.c.bf16 %v633_v4, %v631_v1  ;;  %v666_v1 = vshrl.u32 %v665_v63, 7  ;;  %v663_v4 = vld [vmem:[%s1385_s12] sm:$0x3] }
  0xfa   :  { %872 = vmatprep.subr.bf16.mxu1 %v871_v21 }
  0xfb   :  { %v428_v48 = vpop.permute.xlu0 %427  ;;  %902 = vmatpush1.bf16.msra.mxu0 %v901_v7  ;;  %v667_v2 = vsub.s32 0, %v666_v1 }
  0xfc   :  { %v430_v50 = vpop.permute.xlu1 %429 }
 0x1cb   :  { %v824_v9 = vpop.f32.mrb[0].mxu1 }
 0x1cc   :  { %v228_v10 = vadd.f32 %v824_v9, %v776_v8  ;;  %v222_v11 = vpop.f32.mrb[1].mxu1  ;;  %v635_v9 = vld [vmem:[#allocation13 + $0x20] sm:$0xff] }
 0x1cd   :  { %v223_v12 = vadd.f32 %v776_v8, %v222_v11  ;;  %v903_v8 = vpack.c.bf16 %v638_v6, %v636_v5  ;;  %v640_v11 = vld [vmem:[#allocation13 + $0x48] sm:$0xff]  ;;  %v671_v5 = vsub.s32 1, %v666_v1  ;;  %v668_v6 = vrot.slane %v663_v4, %v667_v2 }
 0x1ce   :  { %v232_v13 = vmax.f32 %v228_v10, 0.0  ;;  %v637_v10 = vld [vmem:[#allocation13 + $0x30] sm:$0xff] }
 0x1cf   :  { %v231_v16 = vmax.f32 %v223_v12, 0.0  ;;  %v642_v12 = vld [vmem:[#allocation13 + $0x58] sm:$0xff]  ;;  %904 = vmatprep.subr.bf16.mxu0 %v903_v8  ;;  %v672_v7 = vrot.slane %v663_v4, %v671_v5 }
 0x1d0   :  { %v234_v18 = vadd.f32 %v232_v13, %v135_v15  ;;  %v905_v13 = vpack.c.bf16 %v637_v10, %v635_v9  ;;  %v639_v15 = vld [vmem:[#allocation13 + $0x40] sm:$0xff] }
 0x1d1   :  { %v233_v17 = vadd.f32 %v231_v16, %v133_v14  ;;  %v907_v14 = vpack.c.bf16 %v642_v12, %v640_v11  ;;  %v641_v16 = vld [vmem:[#allocation13 + $0x50] sm:$0xff] }
 0x1d2   :  { %906 = vmatpush1.bf16.msra.mxu0 %v905_v13  ;;  %v909_v19 = vpack.c.bf16 %v641_v16, %v639_v15 }
 0x1d3   :  { %827 = vmatprep.mubr.msk.f32.mxu1 %vm243_vm1, %v233_v17  ;;  %v644_v17 = vld [vmem:[#allocation13 + $0x68] sm:$0xff]  ;;  %908 = vmatprep.subr.bf16.mxu0 %v907_v14 }
 0x1d4   :  { %828 = vmatmul.mubr.msk.f32.vlgmr.msra.gmra.mrb[2].mxu1 %vm243_vm1, %v234_v18  ;;  %v646_v18 = vld [vmem:[#allocation13 + $0x78] sm:$0xff] }
 0x1d5   :  { %874 = vmatpush3.bf16.msra.mxu1 %v871_v21  ;;  %v911_v20 = vpack.c.bf16 %v646_v18, %v644_v17  ;;  %v643_v21 = vld [vmem:[#allocation13 + $0x60] sm:$0xff] }
 0x1d6   :  { %876 = vmatprep.subr.bf16.mxu1 %v875_v35  ;;  %910 = vmatpush1.bf16.msra.mxu0 %v909_v19 }
 0x1d7   :  { %912 = vmatprep.subr.bf16.mxu0 %v911_v20 }
 0x2a7   :  { %v829_v24 = vpop.f32.mrb[2].mxu1 }
 0x2a8   :  { %v322_v25 = vadd.f32 %v829_v24, %v779_v23  ;;  %v316_v26 = vpop.f32.mrb[3].mxu1  ;;  %v650_v24 = vld [vmem:[#allocation13 + $0x98] sm:$0xff] }
 0x2a9   :  { %v317_v27 = vadd.f32 %v779_v23, %v316_v26  ;;  %v648_v23 = vld [vmem:[#allocation13 + $0x88] sm:$0xff] }
 0x2aa   :  { %v326_v28 = vmax.f32 %v322_v25, 0.0  ;;  %v915_v26 = vpack.c.bf16 %v650_v24, %v648_v23 }
 0x2ab   :  { %v325_v29 = vmax.f32 %v317_v27, 0.0  ;;  %v647_v27 = vld [vmem:[#allocation13 + $0x80] sm:$0xff] }
 0x2ac   :  { %v334_v32 = vadd.f32 %v330_v30, %v326_v28  ;;  %v649_v28 = vld [vmem:[#allocation13 + $0x90] sm:$0xff]  ;;  %v654_v30 = vld [vmem:[#allocation13 + $0xb8] sm:$0xff] }
 0x2ad   :  { %v333_v31 = vadd.f32 %v328_v22, %v325_v29  ;;  %v645_v22 = vld [vmem:[#allocation13 + $0x70] sm:$0xff]  ;;  %v652_v29 = vld [vmem:[#allocation13 + $0xa8] sm:$0xff] }
 0x2ae   :  { %v913_v25 = vpack.c.bf16 %v645_v22, %v643_v21 }
 0x2af   :  { %834 = vmatprep.mubr.msk.f32.mxu1 %vm151_vm0, %v333_v31  ;;  %v917_v31 = vpack.c.bf16 %v649_v28, %v647_v27 }
 0x2b0   :  { %835 = vmatmul.mubr.msk.f32.vlgmr.msra.gmra.mrb[4].mxu1 %vm151_vm0, %v334_v32  ;;  %914 = vmatpush1.bf16.msra.mxu0 %v913_v25  ;;  %v919_v32 = vpack.c.bf16 %v654_v30, %v652_v29 }
 0x2b1   :  { %878 = vmatpush3.bf16.msra.mxu1 %v875_v35  ;;  %916 = vmatprep.subr.bf16.mxu0 %v915_v26  ;;  %v656_v35 = vld [vmem:[#allocation13 + $0xc8] sm:$0xff] }
 0x2b2   :  { %880 = vmatprep.subr.bf16.mxu1 %v879_v38 }
 0x2b4   :  { %918 = vmatpush1.bf16.msra.mxu0 %v917_v31 }
 0x2b5   :  { %882 = vmatpush3.bf16.msra.mxu1 %v879_v38  ;;  %920 = vmatprep.subr.bf16.mxu0 %v919_v32  ;;  %v923_v38 = vpack.c.bf16 %v658_v36, %v656_v35 }
 0x2b6   :  { %884 = vmatprep.subr.bf16.mxu1 %v883_v41 }
 0x2b8   :  { %922 = vmatpush1.bf16.msra.mxu0 %v921_v37 }
 0x2b9   :  { %924 = vmatprep.subr.bf16.mxu0 %v923_v38 }
 0x383   :  { %v836_v43 = vpop.f32.mrb[4].mxu1 }
 0x384   :  { %v422_v44 = vadd.f32 %v836_v43, %v782_v42  ;;  %v416_v45 = vpop.f32.mrb[5].mxu1 }
 0x385   :  { %v417_v46 = vadd.f32 %v782_v42, %v416_v45  ;;  %v785_v42 = vld [vmem:[%s1381_s8] ss:$0 sm:$0xff] }
 0x386   :  { %v426_v47 = vmax.f32 %v422_v44, 0.0 }
 0x387   :  { %v425_v49 = vmax.f32 %v417_v46, 0.0 }
 0x388   :  { %v434_v54 = vadd.f32 %v430_v50, %v426_v47 }
 0x389   :  { %v433_v53 = vadd.f32 %v428_v48, %v425_v49 }
 0x38b   :  { %845 = vmatprep.mubr.msk.f32.mxu1 %vm446_vm2, %v433_v53  ;;  %v927_v53 = vpack.c.bf16 %v662_v52, %v660_v51 }
 0x38c   :  { %846 = vmatmul.mubr.msk.f32.vlgmr.msra.gmra.mrb[6].mxu1 %vm446_vm2, %v434_v54  ;;  %v659_v54 = vld [vmem:[#allocation13 + $0xe0] sm:$0xff] }
 0x38d   :  { %886 = vmatpush3.bf16.msra.mxu1 %v883_v41  ;;  %v925_v41 = vpack.c.bf16 %v657_v40, %v655_v39 }
 0x38e   :  { %888 = vmatprep.subr.bf16.mxu1 %v887_v55 }
 0x38f   :  { %926 = vmatpush1.bf16.msra.mxu0 %v925_v41 }
 0x390   :  { %928 = vmatprep.subr.bf16.mxu0 %v927_v53 }
 0x391   :  { %890 = vmatpush3.bf16.msra.mxu1 %v887_v55  ;;  %v661_v55 = vld [vmem:[#allocation13 + $0xf0] sm:$0xff] }
 0x392   :  { %892 = vmatprep.subr.bf16.mxu1 %v891_v58  ;;  %v929_v56 = vpack.c.bf16 %v661_v55, %v659_v54 }
 0x394   :  { %930 = vmatpush1.bf16.msra.mxu0 %v929_v56 }
 0x395   :  { %894 = vmatpush3.bf16.msra.mxu1 %v891_v58  ;;  %v788_v58 = vld [vmem:[%s1383_s10] ss:$0 sm:$0xff]  ;;  %s1146_s10 = smov [#allocation14]  }
 0x396   :  { %896 = vmatprep.subr.bf16.mxu1 %v895_v61  ;;  %s761_s6 = sshll.u32 %s1146_s10, 4  ;;  %s762_s6 = int_to_ptr.vmem [resolvable:$true] %s761_s6 }
 0x397   :  { %s1100_s28 = scalar_lea.vmem %s762_s6, 512  ;;  %p1105_p1 = scmp.lt.s32.totalorder %s762_s6, %s762_s6 }
 0x398   :  { %p1101_p0 = scmp.ne.s32.totalorder %s762_s6, %s1100_s28  ;;  %p1106_p2 = scmp.lt.s32.totalorder %s1100_s28, %s1100_s28 }
 0x399   :  { %898 = vmatpush3.bf16.msra.mxu1 %v895_v61 }
 0x39a   :  { %p1107_p3 = por %p1106_p2, %p1105_p1 }
 0x39c   :  { %p1108_p4 = pnand %p1107_p3, %p1101_p0 }
 0x45f   :  { %v847_v43 = vpop.f32.mrb[6].mxu1 }
 0x460   :  { %v525_v44 = vadd.f32 %v847_v43, %v785_v42  ;;  %v519_v45 = vpop.f32.mrb[7].mxu1 }
 0x461   :  { %v520_v46 = vadd.f32 %v785_v42, %v519_v45 }
 0x462   :  { %v529_v47 = vmax.f32 %v525_v44, 0.0 }
 0x463   :  { %v528_v48 = vmax.f32 %v520_v46, 0.0 }
 0x464   :  { %v531_v50 = vadd.f32 %v529_v47, %v1318_v3 }
 0x465   :  { %v530_v49 = vadd.f32 %v528_v48, %v1307_v0 }
 0x467   :  { %864 = vmatprep.mubr.msk.f32.mxu1 %vm547_vm3, %v530_v49 }
 0x468   :  { %865 = vmatmul.mubr.msk.f32.vlgmr.msra.gmra.mrb[8].mxu1 %vm547_vm3, %v531_v50 }
 0x53b   :  { %v866_v59 = vpop.f32.mrb[8].mxu1 }
 0x53c   :  { %v620_v0 = vpop.f32.mrb[9].mxu1  ;;  %v626_v3 = vadd.f32 %v866_v59, %v788_v58 }
 0x53d   :  { %v621_v60 = vadd.f32 %v788_v58, %v620_v0 }
 0x53e   :  { %v630_v62 = vmax.f32 %v626_v3, 0.0 }
 0x53f   :  { %v629_v61 = vmax.f32 %v621_v60, 0.0 }
 0x541   :  { %740 = vmatmul.mubr.f32.vlgmr.msra.gmra.mrb[0].mxu0 %v629_v61 }
 0x542   :  { %745 = vmatprep.mubr.f32.mxu0 %v1145_v57 }
 0x545   :  { %746 = vmatmul.mubr.f32.gmra.mrb[2].mxu0 %v630_v62 }
 0x614   :  { %v741_v8 = vpop.f32.mrb[0].mxu0 }
 0x615   :  { %v742_v9 = vadd.f32 %v741_v8, %v668_v6  ;;  %v743_v10 = vpop.f32.mrb[1].mxu0 }
 0x616   :  { %v744_v11 = vadd.f32 %v743_v10, %v672_v7 }
 0x617   :  { %752 = vst [vmem:[#allocation14] sm:$0xff] %v742_v9 }
 0x618   :  { %753 = vst [vmem:[#allocation14 + $0x8] sm:$0xff] %v744_v11  ;;  %v747_v12 = vpop.f32.mrb[2].mxu0 }
 0x619   :  { %v748_v13 = vadd.f32 %v747_v12, %v668_v6  ;;  %v749_v14 = vpop.f32.mrb[3].mxu0 }
 0x61a   :  { %v750_v15 = vadd.f32 %v749_v14, %v672_v7 }
 0x61b   :  { %754 = vst [vmem:[#allocation14 + $0x10] sm:$0xff] %v748_v13 }
 0x61c   :  { %755 = vst [vmem:[#allocation14 + $0x18] sm:$0xff] %v750_v15 }
 0x61d   :  { %1111 = shalt.err (!%p1108_p4)
}
 0x61e   :  { %s1112_s23 = scalar_lea.hbm %s1386_s13, 512 }
 0x61f   :  { %p1113_p5 = scmp.ne.s32.totalorder %s1386_s13, %s1112_s23  ;;  %p1116_p6 = scmp.lt.u32.totalorder %s1112_s23, %s1386_s13 }
 0x621   :  { %p1118_p7 = pnand %p1116_p6, %p1113_p5 }
 0x623   :  { %1121 = shalt.err (!%p1118_p7)
}
 0x624   :  { %767 = dma.vmem_to_hbm [thread:$0]  %s762_s6, 512, %s1386_s13, [#allocation4], %s1138_s9, %s1138_s9, %s1139_s18  }
 0x625   :  { %1130 = dma.done.wait [#allocation4], 512  }
 0x626   :  { %1131 = vsyncadd [#allocation4], 4294966784 }
 0x627   :  { %771 = vsyncpa [#allocation3], 1 }
 0x628   :  { %772 = vsyncpa [#allocation6], 1 }
 0x629   :  { %773 = vsyncpa [#allocation9], 1 }
 0x62a   :  { %774 = vsyncpa [#allocation12], 1 }
 0x62b   :  { %775 = vsyncpa [#allocation4], 1 }

</bundles_post_ra>
